<compile_context>
chip_gen: v5e
topology: v5e:2x2
jax: 0.10.0
libtpu: 0.0.40
codegen_flags: <defaults>
</compile_context>

<pallas_src>
import jax
import jax.numpy as jnp
from jax.experimental import pallas as pl
from jax.experimental.pallas import tpu as pltpu


def _round_up(x, m):
    return ((x + m - 1) // m) * m


def _sublane_for(dtype):
    # Sub-32-bit dtypes pack along sublanes: min native sublane tile is
    # 8 (32-bit) / 16 (16-bit) / 32 (8-bit).
    return {4: 8, 2: 16, 1: 32}.get(jnp.dtype(dtype).itemsize, 8)


# ----------------------------- kernels ------------------------------------
# x_ref: (tm, tk), w_ref: (tk, tn)  [W already transposed to K-major],
# b_ref: (1, tn) float32, o_ref: (tm, tn), acc_ref: (tm, tn) float32.

def _kernel_direct_nobias(x_ref, w_ref, o_ref):
    k = pl.program_id(2)

    @pl.when(k == 0)
    def _():
        o_ref[...] = jnp.zeros_like(o_ref)

    o_ref[...] += jnp.dot(x_ref[...], w_ref[...],
                          preferred_element_type=jnp.float32)


def _kernel_direct_bias(x_ref, w_ref, b_ref, o_ref):
    k = pl.program_id(2)

    @pl.when(k == 0)
    def _():
        o_ref[...] = jnp.zeros_like(o_ref)

    o_ref[...] += jnp.dot(x_ref[...], w_ref[...],
                          preferred_element_type=jnp.float32)

    @pl.when(k == pl.num_programs(2) - 1)
    def _():
        o_ref[...] += b_ref[...]          # bias is float32, o_ref is float32


def _kernel_scratch_nobias(x_ref, w_ref, o_ref, acc_ref):
    k = pl.program_id(2)

    @pl.when(k == 0)
    def _():
        acc_ref[...] = jnp.zeros_like(acc_ref)

    acc_ref[...] += jnp.dot(x_ref[...], w_ref[...],
                            preferred_element_type=jnp.float32)

    @pl.when(k == pl.num_programs(2) - 1)
    def _():
        o_ref[...] = acc_ref[...].astype(o_ref.dtype)


def _kernel_scratch_bias(x_ref, w_ref, b_ref, o_ref, acc_ref):
    k = pl.program_id(2)

    @pl.when(k == 0)
    def _():
        acc_ref[...] = jnp.zeros_like(acc_ref)

    acc_ref[...] += jnp.dot(x_ref[...], w_ref[...],
                            preferred_element_type=jnp.float32)

    @pl.when(k == pl.num_programs(2) - 1)
    def _():
        o_ref[...] = (acc_ref[...] + b_ref[...]).astype(o_ref.dtype)


# --------------------------- host wrappers ---------------------------------

def prepare_linear_params(weight, bias=None, *, tn=512, tk=512, compute_dtype=None):
    """One-time weight/bias preparation (hoist OUT of the hot path).

    weight: [out_features, in_features] (torch layout). Transposed to the
    MXU-native [K, N] layout and zero-padded to (tk, tn) multiples (zeros are
    inert in the reduction). Bias is kept float32 end-to-end.
    Returns (w_kn_padded, bias_2d_padded_or_None, out_features).
    """
    N, K = weight.shape
    if compute_dtype is not None:
        weight = weight.astype(compute_dtype)   # e.g. bf16 on v6e/v7x
    tk = min(tk, _round_up(K, 128))
    tn = min(tn, _round_up(N, 128))
    Kp, Np = _round_up(K, tk), _round_up(N, tn)

    w_kn = weight.T                              # [K, N]
    if (Kp, Np) != (K, N):
        w_kn = jnp.pad(w_kn, ((0, Kp - K), (0, Np - N)))

    b2d = None
    if bias is not None:
        b2d = bias.astype(jnp.float32).reshape(1, N)
        if Np != N:
            b2d = jnp.pad(b2d, ((0, 0), (0, Np - N)))
    return w_kn, b2d, N


def linear_pallas(x, w_kn, b2d=None, *, out_features=None,
                  tm=512, tn=512, tk=512, out_dtype=None):
    """Hot path: y = x @ W^T + b with W already prepared by prepare_linear_params.

    x:    [..., in_features]
    w_kn: [Kp, Np]  (prepared: transposed + padded)
    b2d:  [1, Np] float32 or None
    """
    Kp, Np = w_kn.shape
    K = x.shape[-1]
    N = Np if out_features is None else out_features
    out_dtype = x.dtype if out_dtype is None else jnp.dtype(out_dtype)

    lead = x.shape[:-1]
    x2d = x.reshape(-1, K)
    if x2d.dtype != w_kn.dtype:
        x2d = x2d.astype(w_kn.dtype)            # match compute dtype (e.g. bf16)
    M = x2d.shape[0]

    # Dtype-aware tile clamps: lane axes stay 128-multiples (enforced by the
    # prepare-time padding); sublane axis rounds to the packing unit.
    tm = min(tm, _round_up(M, _sublane_for(x2d.dtype)))
    tk = min(tk, Kp)
    tn = min(tn, Np)
    assert Kp % tk == 0 and Np % tn == 0, "prepared weight padding must match tk/tn"

    # v7x has 2 TensorCores sharded over the 'parallel' axes: avoid a 1x1xK grid
    # when a wide tile could be split into two lane-dense N tiles.
    if (pl.cdiv(M, tm) * (Np // tn)) == 1 and tn >= 512:
        tn //= 2

    Mp = _round_up(M, tm)
    if (Mp, Kp) != (M, K):
        x2d = jnp.pad(x2d, ((0, Mp - M), (0, Kp - K)))

    grid = (Mp // tm, Np // tn, Kp // tk)
    has_bias = b2d is not None
    direct = out_dtype == jnp.dtype(jnp.float32)   # accumulate in place in o_ref

    in_specs = [
        pl.BlockSpec((tm, tk), lambda i, j, k: (i, k)),   # x tile
        pl.BlockSpec((tk, tn), lambda i, j, k: (k, j)),   # W^T tile, K on sublane
    ]
    args = [x2d, w_kn]
    if has_bias:
        in_specs.append(pl.BlockSpec((1, tn), lambda i, j, k: (0, j)))
        args.append(b2d)

    if direct:
        kernel = _kernel_direct_bias if has_bias else _kernel_direct_nobias
        scratch_shapes = []
        acc_bytes = 0
    else:
        kernel = _kernel_scratch_bias if has_bias else _kernel_scratch_nobias
        scratch_shapes = [pltpu.VMEM((tm, tn), jnp.float32)]
        acc_bytes = tm * tn * 4

    xb = jnp.dtype(x2d.dtype).itemsize
    wb = jnp.dtype(w_kn.dtype).itemsize
    ob = jnp.dtype(out_dtype).itemsize

    # Double-buffered footprint: 2x x-tile + 2x w-tile + 2x out-tile (+ acc + bias).
    footprint = (2 * tm * tk * xb + 2 * tk * tn * wb + 2 * tm * tn * ob
                 + acc_bytes + (2 * tn * 4 if has_bias else 0))
    vmem_limit = min(2 * footprint + (8 << 20), 100 << 20)

    bytes_accessed = (Mp * Kp * xb + Kp * Np * wb + Mp * Np * ob
                      + (Np * 4 if has_bias else 0))
    cost = pl.CostEstimate(flops=2 * Mp * Np * Kp, transcendentals=0,
                           bytes_accessed=bytes_accessed)

    out = pl.pallas_call(
        kernel,
        out_shape=jax.ShapeDtypeStruct((Mp, Np), out_dtype),
        grid_spec=pltpu.PrefetchScalarGridSpec(
            num_scalar_prefetch=0,
            grid=grid,
            in_specs=in_specs,
            out_specs=pl.BlockSpec((tm, tn), lambda i, j, k: (i, j)),
            scratch_shapes=scratch_shapes,
        ),
        compiler_params=pltpu.CompilerParams(
            dimension_semantics=("parallel", "parallel", "arbitrary"),
            vmem_limit_bytes=vmem_limit,
        ),
        cost_estimate=cost,
    )(*args)

    if (Mp, Np) != (M, N):
        out = out[:M, :N]
    return out.reshape(*lead, N)


def linear_forward(x, weight, bias=None, *, tm=512, tn=512, tk=512,
                   compute_dtype=None):
    """Convenience wrapper (prepare + call). For repeated calls with a static
    weight, call prepare_linear_params once and reuse the prepared arrays."""
    w_kn, b2d, n = prepare_linear_params(weight, bias, tn=tn, tk=tk,
                                         compute_dtype=compute_dtype)
    return linear_pallas(x, w_kn, b2d, out_features=n, tm=tm, tn=tn, tk=tk,
                         out_dtype=x.dtype)


def init_params(key, in_features, out_features, dtype=jnp.float32, bias=True):
    # torch.nn.init.xavier_normal_: std = gain * sqrt(2 / (fan_in + fan_out)), gain=1
    std = (2.0 / (in_features + out_features)) ** 0.5
    w = jax.random.normal(key, (out_features, in_features), dtype=dtype) * std
    b = jnp.zeros((out_features,), dtype=dtype) if bias else None  # zeros_ init
    return w, b


if __name__ == "__main__":
    key = jax.random.PRNGKey(0)
    k_x, k_w = jax.random.split(key)

    batch, seq = 2, 8
    in_features, out_features = 32, 64

    x = jax.random.normal(k_x, (batch, seq, in_features), dtype=jnp.float32)
    weight, bias = init_params(k_w, in_features, out_features, dtype=jnp.float32)

    # --- f32 path (direct in-place accumulation into the output block) -------
    w_kn, b2d, n = prepare_linear_params(weight, bias)        # one-time weight prep
    y = linear_pallas(x, w_kn, b2d, out_features=n)
    jax.block_until_ready(y)
    y_ref = jnp.einsum("bsk,nk->bsn", x, weight) + bias
    assert y.shape == (batch, seq, out_features)
    assert jnp.allclose(y, y_ref, atol=1e-5, rtol=1e-5)

    # --- no-bias path ---------------------------------------------------------
    w_kn_nb, _, n_nb = prepare_linear_params(weight, None)
    y_nb = linear_pallas(x, w_kn_nb, None, out_features=n_nb)
    jax.block_until_ready(y_nb)
    y_nb_ref = jnp.einsum("bsk,nk->bsn", x, weight)
    assert jnp.allclose(y_nb, y_nb_ref, atol=1e-5, rtol=1e-5)

    # --- bf16 compute path (exercises the f32-scratch accumulator kernel) ----
    x_bf16 = x.astype(jnp.bfloat16)
    y_bf16 = linear_forward(x_bf16, weight, bias, compute_dtype=jnp.bfloat16)
    jax.block_until_ready(y_bf16)
    assert y_bf16.dtype == jnp.bfloat16
    assert jnp.allclose(y_bf16.astype(jnp.float32), y_ref, atol=5e-2, rtol=5e-2)

    print("KERNEL_OK")
</pallas_src>

<mosaic_0001>
module attributes {stable_mosaic.version = 11 : i64} {
  func.func @_kernel_direct_bias(%arg0: i32, %arg1: i32, %arg2: i32, %arg3: memref<16x128xf32, #tpu.memory_space<vmem>>, %arg4: memref<128x128xf32, #tpu.memory_space<vmem>>, %arg5: memref<1x128xf32, #tpu.memory_space<vmem>>, %arg6: memref<16x128xf32, #tpu.memory_space<vmem>>) attributes {dimension_semantics = [#tpu.dimension_semantics<parallel>, #tpu.dimension_semantics<parallel>, #tpu.dimension_semantics<arbitrary>], iteration_bounds = array<i64: 1, 1, 1>, scalar_prefetch = 0 : i64, scratch_operands = 0 : i64, tpu.core_type = #tpu.core_type<tc>, window_params = [{transform_indices = @transform_0, window_bounds = array<i64: 16, 128>}, {transform_indices = @transform_1, window_bounds = array<i64: 128, 128>}, {transform_indices = @transform_2, window_bounds = array<i64: 1, 128>}, {transform_indices = @transform_3, window_bounds = array<i64: 16, 128>}]} {
    %c0_i32 = arith.constant 0 : i32
    %0 = arith.cmpi eq, %arg2, %c0_i32 : i32
    %1 = arith.extui %0 : i1 to i32
    %c0_i32_0 = arith.constant 0 : i32
    %2 = arith.cmpi ne, %1, %c0_i32_0 : i32
    scf.if %2 {
      %cst_10 = arith.constant 0.000000e+00 : f32
      %12 = vector.broadcast %cst_10 : f32 to vector<16x128xf32>
      %c0_11 = arith.constant 0 : index
      %c0_12 = arith.constant 0 : index
      %13 = vector.load %arg6[%c0_11, %c0_12] : memref<16x128xf32, #tpu.memory_space<vmem>>, vector<16x128xf32>
      tpu.vector_store %arg6[%c0_11, %c0_12], %12 {strides = array<i32>} : memref<16x128xf32, #tpu.memory_space<vmem>>, vector<16x128xf32>,
    } else {
    }
    %c0 = arith.constant 0 : index
    %c0_1 = arith.constant 0 : index
    %3 = vector.load %arg6[%c0, %c0_1] : memref<16x128xf32, #tpu.memory_space<vmem>>, vector<16x128xf32>
    %c0_2 = arith.constant 0 : index
    %c0_3 = arith.constant 0 : index
    %4 = vector.load %arg3[%c0_2, %c0_3] : memref<16x128xf32, #tpu.memory_space<vmem>>, vector<16x128xf32>
    %c0_4 = arith.constant 0 : index
    %c0_5 = arith.constant 0 : index
    %5 = vector.load %arg4[%c0_4, %c0_5] : memref<128x128xf32, #tpu.memory_space<vmem>>, vector<128x128xf32>
    %cst = arith.constant dense<0.000000e+00> : vector<16x128xf32>
    %6 = tpu.matmul %4, %5, %cst {dimension_numbers = #tpu.dot_dimension_numbers<[1], [0], [0], [1], [0, 0, 1, 1], [], []>} : vector<16x128xf32>, vector<128x128xf32>, vector<16x128xf32> -> vector<16x128xf32>
    %7 = arith.addf %3, %6 : vector<16x128xf32>
    %c0_6 = arith.constant 0 : index
    %c0_7 = arith.constant 0 : index
    %8 = vector.load %arg6[%c0_6, %c0_7] : memref<16x128xf32, #tpu.memory_space<vmem>>, vector<16x128xf32>
    tpu.vector_store %arg6[%c0_6, %c0_7], %7 {strides = array<i32>} : memref<16x128xf32, #tpu.memory_space<vmem>>, vector<16x128xf32>,
    %c0_i32_8 = arith.constant 0 : i32
    %9 = arith.cmpi eq, %arg2, %c0_i32_8 : i32
    %10 = arith.extui %9 : i1 to i32
    %c0_i32_9 = arith.constant 0 : i32
    %11 = arith.cmpi ne, %10, %c0_i32_9 : i32
    scf.if %11 {
      %c0_10 = arith.constant 0 : index
      %c0_11 = arith.constant 0 : index
      %12 = vector.load %arg6[%c0_10, %c0_11] : memref<16x128xf32, #tpu.memory_space<vmem>>, vector<16x128xf32>
      %c0_12 = arith.constant 0 : index
      %c0_13 = arith.constant 0 : index
      %13 = vector.load %arg5[%c0_12, %c0_13] : memref<1x128xf32, #tpu.memory_space<vmem>>, vector<1x128xf32>
      %14 = vector.broadcast %13 : vector<1x128xf32> to vector<16x128xf32>
      %15 = arith.addf %12, %14 : vector<16x128xf32>
      %c0_14 = arith.constant 0 : index
      %c0_15 = arith.constant 0 : index
      %16 = vector.load %arg6[%c0_14, %c0_15] : memref<16x128xf32, #tpu.memory_space<vmem>>, vector<16x128xf32>
      tpu.vector_store %arg6[%c0_14, %c0_15], %15 {strides = array<i32>} : memref<16x128xf32, #tpu.memory_space<vmem>>, vector<16x128xf32>,
    } else {
    }
    return
  }
  func.func @transform_0(%arg0: i32, %arg1: i32, %arg2: i32) -> (i32, i32) {
    %c0_i32 = arith.constant 0 : i32
    return %arg0, %arg2 : i32, i32
  }
  func.func @transform_1(%arg0: i32, %arg1: i32, %arg2: i32) -> (i32, i32) {
    %c0_i32 = arith.constant 0 : i32
    return %arg2, %arg1 : i32, i32
  }
  func.func @transform_2(%arg0: i32, %arg1: i32, %arg2: i32) -> (i32, i32) {
    %c0_i32 = arith.constant 0 : i32
    %c0_i32_0 = arith.constant 0 : i32
    return %c0_i32, %arg1 : i32, i32
  }
  func.func @transform_3(%arg0: i32, %arg1: i32, %arg2: i32) -> (i32, i32) {
    %c0_i32 = arith.constant 0 : i32
    return %arg0, %arg1 : i32, i32
  }
}

</mosaic_0001>

<bundles_post_ra>
// kernel: tpu_custom_call.1
= control target key start
LH: loop header
LB: loop body
LE: loop exit
PB: predicated region body
PF: predicated region fallthrough
CT: control target
= control target key end

     0   :  { %8 = vsyncpa [#allocation3], 0  ;;  %s280_s0 = inlined_call_operand.hbm [shape: f32[16,128], index: 0, kind: input, shape index: {}]   ;;  %s281_s1 = inlined_call_operand.hbm [shape: f32[128,128], index: 1, kind: input, shape index: {}]   ;;  %s282_s2 = inlined_call_operand.vmem [shape: f32[1,128], index: 2, kind: input, shape index: {}]   ;;  %s283_s3 = inlined_call_operand.hbm [shape: f32[16,128], index: 3, kind: output, shape index: {}]  }
   0x1   :  { %9 = vsyncpa [#allocation6], 0 }
   0x2   :  { %10 = vsyncpa [#allocation4], 0  ;;  %s15_s14 = sshll.u32 %s280_s0, 4  ;;  %s234_s15 = smov [#allocation2]   ;;  %s16_s14 = int_to_ptr.hbm [resolvable:$true] %s15_s14 }
   0x3   :  { %s17_s16 = sshll.u32 %s234_s15, 4  ;;  %s28_s19 = sshll.u32 %s281_s1, 4  ;;  %s18_s16 = int_to_ptr.vmem [resolvable:$true] %s17_s16  ;;  %s29_s19 = int_to_ptr.hbm [resolvable:$true] %s28_s19 }
   0x4   :  { %s235_s20 = smov 128   ;;  %s236_s21 = smov 8  }
   0x5   :  { %23 = dma.hbm_to_vmem [thread:$0]  %s16_s14, 256, %s18_s16, [#allocation3], %s235_s20, %s235_s20, %s236_s21  }
   0x6   :  { %s237_s22 = smov [#allocation5]  }
   0x7   :  { %s30_s23 = sshll.u32 %s237_s22, 4  ;;  %s31_s23 = int_to_ptr.vmem [resolvable:$true] %s30_s23 }
   0x8   :  { %36 = dma.hbm_to_vmem [thread:$0]  %s29_s19, 2048, %s31_s23, [#allocation6], %s235_s20, %s235_s20, %s236_s21  }
   0x9   :  { %228 = dma.done.wait [#allocation3], 256  }
   0xa   :  { %229 = vsyncadd [#allocation3], 4294967040 }
   0xb   :  { %230 = dma.done.wait [#allocation6], 2048  }
   0xc   :  { %231 = vsyncadd [#allocation6], 4294965248  ;;  %v72_v0 = vld [vmem:[#allocation5 + $0x78] sm:$0xff]  ;;  %v71_v1 = vld [vmem:[#allocation5 + $0x70] sm:$0xff]  ;;  %s238_s24 = smov [#allocation7]   ;;  %s119_s28 = sshll.u32 %s283_s3, 4  ;;  %s120_s28 = int_to_ptr.hbm [resolvable:$true] %s119_s28 }
   0xd   :  { %73 = vmatpush.msra.mxu0 %v72_v0  ;;  %133 = vmatpush.msra.mxu1 %v72_v0  ;;  %v70_v2 = vld [vmem:[#allocation5 + $0x68] sm:$0xff]  ;;  %v69_v3 = vld [vmem:[#allocation5 + $0x60] sm:$0xff]  ;;  %v68_v4 = vld [vmem:[#allocation5 + $0x58] sm:$0xff]  ;;  %s117_s25 = sshll.u32 %s238_s24, 4  ;;  %s118_s25 = int_to_ptr.vmem [resolvable:$true] %s117_s25 }
   0xe   :  { %v67_v5 = vld [vmem:[#allocation5 + $0x50] sm:$0xff]  ;;  %v66_v6 = vld [vmem:[#allocation5 + $0x48] sm:$0xff]  ;;  %v65_v7 = vld [vmem:[#allocation5 + $0x40] sm:$0xff] }
   0xf   :  { %74 = vmatpush.msra.mxu0 %v71_v1  ;;  %134 = vmatpush.msra.mxu1 %v71_v1  ;;  %v64_v8 = vld [vmem:[#allocation5 + $0x38] sm:$0xff]  ;;  %v63_v9 = vld [vmem:[#allocation5 + $0x30] sm:$0xff]  ;;  %v62_v10 = vld [vmem:[#allocation5 + $0x28] sm:$0xff] }
  0x10   :  { %v61_v11 = vld [vmem:[#allocation5 + $0x20] sm:$0xff]  ;;  %v60_v12 = vld [vmem:[#allocation5 + $0x18] sm:$0xff]  ;;  %v59_v13 = vld [vmem:[#allocation5 + $0x10] sm:$0xff] }
  0x11   :  { %75 = vmatpush.msra.mxu0 %v70_v2  ;;  %135 = vmatpush.msra.mxu1 %v70_v2  ;;  %v58_v14 = vld [vmem:[#allocation5 + $0x8] sm:$0xff]  ;;  %v57_v15 = vld [vmem:[#allocation5] sm:$0xff]  ;;  %v55_v16 = vld [vmem:[#allocation2] sm:$0xff] }
  0x12   :  { %v56_v17 = vld [vmem:[#allocation2 + $0x8] sm:$0xff]  ;;  %v155_v18 = vld [vmem:[%s282_s2] ss:$0 sm:$0xff] }
  0x13   :  { %76 = vmatpush.msra.mxu0 %v69_v3  ;;  %136 = vmatpush.msra.mxu1 %v69_v3 }
  0x15   :  { %77 = vmatpush.msra.mxu0 %v68_v4  ;;  %137 = vmatpush.msra.mxu1 %v68_v4 }
  0x17   :  { %78 = vmatpush.msra.mxu0 %v67_v5  ;;  %138 = vmatpush.msra.mxu1 %v67_v5 }
  0x19   :  { %79 = vmatpush.msra.mxu0 %v66_v6  ;;  %139 = vmatpush.msra.mxu1 %v66_v6 }
  0x1b   :  { %80 = vmatpush.msra.mxu0 %v65_v7  ;;  %140 = vmatpush.msra.mxu1 %v65_v7 }
  0x1d   :  { %81 = vmatpush.msra.mxu0 %v64_v8  ;;  %141 = vmatpush.msra.mxu1 %v64_v8 }
  0x1f   :  { %82 = vmatpush.msra.mxu0 %v63_v9  ;;  %142 = vmatpush.msra.mxu1 %v63_v9 }
  0x21   :  { %83 = vmatpush.msra.mxu0 %v62_v10  ;;  %143 = vmatpush.msra.mxu1 %v62_v10 }
  0x23   :  { %84 = vmatpush.msra.mxu0 %v61_v11  ;;  %144 = vmatpush.msra.mxu1 %v61_v11 }
  0x25   :  { %85 = vmatpush.msra.mxu0 %v60_v12  ;;  %145 = vmatpush.msra.mxu1 %v60_v12 }
  0x27   :  { %86 = vmatpush.msra.mxu0 %v59_v13  ;;  %146 = vmatpush.msra.mxu1 %v59_v13 }
  0x29   :  { %87 = vmatpush.msra.mxu0 %v58_v14  ;;  %147 = vmatpush.msra.mxu1 %v58_v14 }
  0x2b   :  { %88 = vmatpush.msra.mxu0 %v57_v15  ;;  %148 = vmatpush.msra.mxu1 %v57_v15 }
  0x2c   :  { %89 = vmatmul.f32.vlgmr.msra.gmra.mxu0 %v55_v16  ;;  %92 = vmatmul.f32.vlgmr.msra.gmra.mxu1 %v56_v17 }
  0xa9   :  { %v90_v19 = vpop.f32.mrf.mxu0  ;;  %v93_v20 = vpop.f32.mrf.mxu1 }
  0xaa   :  { %v109_v21 = vadd.f32 %v155_v18, %v90_v19  ;;  %v110_v22 = vadd.f32 %v155_v18, %v93_v20 }
  0xac   :  { %111 = vst [vmem:[#allocation7] sm:$0xff] %v109_v21 }
  0xad   :  { %112 = vst [vmem:[#allocation7 + $0x8] sm:$0xff] %v110_v22 }
  0xae   :  { %125 = dma.vmem_to_hbm [thread:$0]  %s118_s25, 256, %s120_s28, [#allocation4], %s235_s20, %s235_s20, %s236_s21  }
  0xaf   :  { %232 = dma.done.wait [#allocation4], 256  }
  0xb0   :  { %233 = vsyncadd [#allocation4], 4294967040 }
  0xb1   :  { %130 = vsyncpa [#allocation3], 1 }
  0xb2   :  { %131 = vsyncpa [#allocation6], 1 }
  0xb3   :  { %132 = vsyncpa [#allocation4], 1 }

</bundles_post_ra>
